<compile_context>
chip_gen: v7x
topology: tpu7x:2x2x1
jax: 0.10.0
libtpu: 0.0.40
codegen_flags: <defaults>
</compile_context>

<pallas_src>
import functools

import jax
import jax.numpy as jnp
from jax.experimental import pallas as pl
from jax.experimental.pallas import tpu as pltpu

HIDDEN = 16

VMEM_LIMIT_BYTES = 32 << 20    # explicit: >= v5e's 16 MiB scoped default, == v6e/v7x
                               # defaults, < v7x's 64 MiB physical VMEM.
_TILE_VMEM_BUDGET = 20 << 20   # keep blocks + fused temporaries well under the limit.


def _round_up(n, m):
    return ((n + m - 1) // m) * m


def _auto_batch_tile(in_dim, out_dim):
    """Largest lane-dense batch tile whose double-buffered in/out blocks plus the
    fused f32 activation temporaries (h1, h2, logits/exp/softmax stats) fit the
    VMEM budget — the review's sizing formula."""
    in_pad = _round_up(in_dim, 8)
    out_pad = _round_up(out_dim, 8)
    per_lane_bytes = 4 * (2 * 2 * (in_pad + out_pad)      # double-buffered x / out blocks
                          + 2 * HIDDEN + 4 * out_pad)     # live temporaries (upper bound)
    tb = (_TILE_VMEM_BUDGET // per_lane_bytes) // 128 * 128
    return int(max(128, min(tb, 128 * 1024)))


def vpg_kernel(x_ref, w1_ref, b1_ref, w2_ref, b2_ref, w3_ref, b3_ref, out_ref):
    # x_ref: [in_dim, TB]  (batch on the lane axis; yT = W @ xT + b == torch y = x @ W.T + b)
    x = x_ref[...]

    # Layer 1: Linear(in, 16) + ReLU
    h1 = jnp.dot(w1_ref[...], x, preferred_element_type=jnp.float32) + b1_ref[...]
    h1 = jnp.maximum(h1, 0.0)

    # Layer 2: Linear(16, 16) + ReLU
    h2 = jnp.dot(w2_ref[...], h1, preferred_element_type=jnp.float32) + b2_ref[...]
    h2 = jnp.maximum(h2, 0.0)

    # Layer 3: Linear(16, out)
    logits = jnp.dot(w3_ref[...], h2, preferred_element_type=jnp.float32) + b3_ref[...]

    # Numerically-stable softmax over the output-feature axis (axis 0 here ==
    # torch's dim=1 on [batch, out]).
    m = jnp.max(logits, axis=0, keepdims=True)
    e = jnp.exp(logits - m)
    denom = jnp.sum(e, axis=0, keepdims=True)
    # EUP approximate reciprocal + one Newton-Raphson step: divide leaves the VPU
    # slot while staying ~f32 exact (error ~ eps_approx^2).
    r = pl.reciprocal(denom, approx=True)
    r = r * (2.0 - denom * r)
    out_ref[...] = (e * r).astype(out_ref.dtype)


@functools.partial(jax.jit, static_argnames=("tb",))
def vpg_forward(x, params, *, tb=None):
    """x: [batch, in_dim] float32.  params: torch-convention weights/biases."""
    w1, b1, w2, b2, w3, b3 = params
    batch, in_dim = x.shape
    out_dim = w3.shape[0]

    if tb is None:
        tb = _auto_batch_tile(in_dim, out_dim)

    # Batch tile on the lane axis: multiple of 128, capped by the VMEM budget.
    batch128 = _round_up(batch, 128)
    tb_eff = min(tb, batch128)
    # v7x megacore: if everything would land in one tile but there is enough work
    # to split, use two grid steps so both TensorCores get a tile.
    if tb_eff >= batch128 and batch128 >= 2 * 128:
        tb_eff = _round_up(batch128 // 2, 128)
    padded = _round_up(batch, tb_eff)
    num_tiles = padded // tb_eff

    # Under jit the transpose + ragged-tail zero-pad fuse into one XLA relayout
    # copy (no standalone HBM pass).  Padded columns give finite softmax values
    # and are sliced away below — no OOB, no NaNs.
    xT = jnp.transpose(x)  # [in_dim, batch]
    if padded != batch:
        xT = jnp.pad(xT, ((0, 0), (0, padded - batch)))

    def resident(arr):  # full-shape block, constant index -> fetched once, reused
        return pl.BlockSpec(arr.shape, lambda i: (0, 0))

    flops = 2 * batch * (in_dim * HIDDEN + HIDDEN * HIDDEN + HIDDEN * out_dim)
    bytes_accessed = 4 * (batch * in_dim + batch * out_dim
                          + sum(int(p.size) for p in params))

    outT = pl.pallas_call(
        vpg_kernel,
        out_shape=jax.ShapeDtypeStruct((out_dim, padded), jnp.float32),
        grid=(num_tiles,),
        in_specs=[
            pl.BlockSpec((in_dim, tb_eff), lambda i: (0, i)),   # streamed x tiles
            resident(w1), resident(b1),
            resident(w2), resident(b2),
            resident(w3), resident(b3),
        ],
        out_specs=pl.BlockSpec((out_dim, tb_eff), lambda i: (0, i)),
        compiler_params=pltpu.CompilerParams(
            dimension_semantics=("parallel",),        # megacore split on v7x
            vmem_limit_bytes=VMEM_LIMIT_BYTES),
        cost_estimate=pl.CostEstimate(
            flops=flops,
            transcendentals=batch * out_dim,
            bytes_accessed=bytes_accessed),
    )(xT, w1, b1, w2, b2, w3, b3)

    # Slice + transpose back; fuses under jit (lane-dense out_spec kept — the
    # in-kernel output transpose loses more to XLU/VMEM lane-padding than the
    # tiny out_dim*batch relayout costs).
    return jnp.transpose(outT[:, :batch])


def init_params(key, in_dim, out_dim):
    """torch.nn.Linear default init U[-1/sqrt(fan_in), 1/sqrt(fan_in)].
    Weights in torch convention [out, in]; biases as [out, 1] so they broadcast
    against the transposed [out, batch_tile] activations."""
    ks = jax.random.split(key, 6)

    def lin(kw, kb, fan_in, fan_out):
        bound = 1.0 / jnp.sqrt(jnp.float32(fan_in))
        w = jax.random.uniform(kw, (fan_out, fan_in), jnp.float32, -bound, bound)
        b = jax.random.uniform(kb, (fan_out, 1), jnp.float32, -bound, bound)
        return w, b

    w1, b1 = lin(ks[0], ks[1], in_dim, HIDDEN)
    w2, b2 = lin(ks[2], ks[3], HIDDEN, HIDDEN)
    w3, b3 = lin(ks[4], ks[5], HIDDEN, out_dim)
    return (w1, b1, w2, b2, w3, b3)


def ref_forward(x, params):
    """Pure-JAX reference matching the PyTorch module exactly."""
    w1, b1, w2, b2, w3, b3 = params
    h1 = jnp.maximum(x @ w1.T + b1[:, 0], 0.0)
    h2 = jnp.maximum(h1 @ w2.T + b2[:, 0], 0.0)
    logits = h2 @ w3.T + b3[:, 0]
    return jax.nn.softmax(logits, axis=-1)


if __name__ == "__main__":
    key = jax.random.PRNGKey(0)
    k_x, k_p, k_x2 = jax.random.split(key, 3)

    in_dim, out_dim = 8, 4
    params = init_params(k_p, in_dim, out_dim)

    # Small single-tile case (matches the module's typical per-step policy input).
    batch = 2
    x = jax.random.normal(k_x, (batch, in_dim), jnp.float32)
    out = jax.block_until_ready(vpg_forward(x, params))
    assert out.shape == (batch, out_dim)
    assert jnp.allclose(jnp.sum(out, axis=-1), 1.0, atol=1e-5)
    assert jnp.allclose(out, ref_forward(x, params), atol=1e-4, rtol=1e-4)

    # Slightly larger case to exercise the multi-tile (2 grid steps) + ragged-pad
    # path, i.e. the v7x megacore-split code path, still at a small size.
    batch2 = 300
    x2 = jax.random.normal(k_x2, (batch2, in_dim), jnp.float32)
    out2 = jax.block_until_ready(vpg_forward(x2, params))
    assert out2.shape == (batch2, out_dim)
    assert jnp.allclose(jnp.sum(out2, axis=-1), 1.0, atol=1e-5)
    assert jnp.allclose(out2, ref_forward(x2, params), atol=1e-4, rtol=1e-4)

    print("KERNEL_OK")
</pallas_src>

<mosaic_0001>
module attributes {stable_mosaic.version = 11 : i64} {
  func.func @vpg_kernel(%arg0: i32, %arg1: memref<8x128xf32, #tpu.memory_space<vmem>>, %arg2: memref<16x8xf32, #tpu.memory_space<vmem>>, %arg3: memref<16x1xf32, #tpu.memory_space<vmem>>, %arg4: memref<16x16xf32, #tpu.memory_space<vmem>>, %arg5: memref<16x1xf32, #tpu.memory_space<vmem>>, %arg6: memref<4x16xf32, #tpu.memory_space<vmem>>, %arg7: memref<4x1xf32, #tpu.memory_space<vmem>>, %arg8: memref<4x128xf32, #tpu.memory_space<vmem>>) attributes {dimension_semantics = [#tpu.dimension_semantics<parallel>], iteration_bounds = array<i64: 1>, scalar_prefetch = 0 : i64, scratch_operands = 0 : i64, tpu.core_type = #tpu.core_type<tc>, window_params = [{transform_indices = @transform_0, window_bounds = array<i64: 8, 128>}, {pipeline_mode = #tpu.pipeline_mode<synchronous>, transform_indices = @transform_1, window_bounds = array<i64: 16, 8>}, {pipeline_mode = #tpu.pipeline_mode<synchronous>, transform_indices = @transform_2, window_bounds = array<i64: 16, 1>}, {pipeline_mode = #tpu.pipeline_mode<synchronous>, transform_indices = @transform_3, window_bounds = array<i64: 16, 16>}, {pipeline_mode = #tpu.pipeline_mode<synchronous>, transform_indices = @transform_4, window_bounds = array<i64: 16, 1>}, {pipeline_mode = #tpu.pipeline_mode<synchronous>, transform_indices = @transform_5, window_bounds = array<i64: 4, 16>}, {pipeline_mode = #tpu.pipeline_mode<synchronous>, transform_indices = @transform_6, window_bounds = array<i64: 4, 1>}, {transform_indices = @transform_7, window_bounds = array<i64: 4, 128>}]} {
    %c0 = arith.constant 0 : index
    %c0_0 = arith.constant 0 : index
    %0 = vector.load %arg1[%c0, %c0_0] : memref<8x128xf32, #tpu.memory_space<vmem>>, vector<8x128xf32>
    %c0_1 = arith.constant 0 : index
    %c0_2 = arith.constant 0 : index
    %1 = vector.load %arg2[%c0_1, %c0_2] : memref<16x8xf32, #tpu.memory_space<vmem>>, vector<16x8xf32>
    %cst = arith.constant dense<0.000000e+00> : vector<16x128xf32>
    %2 = tpu.matmul %1, %0, %cst {dimension_numbers = #tpu.dot_dimension_numbers<[1], [0], [0], [1], [0, 0, 1, 1], [], []>} : vector<16x8xf32>, vector<8x128xf32>, vector<16x128xf32> -> vector<16x128xf32>
    %c0_3 = arith.constant 0 : index
    %c0_4 = arith.constant 0 : index
    %3 = vector.load %arg3[%c0_3, %c0_4] : memref<16x1xf32, #tpu.memory_space<vmem>>, vector<16x1xf32>
    %4 = vector.broadcast %3 : vector<16x1xf32> to vector<16x128xf32>
    %5 = arith.addf %2, %4 : vector<16x128xf32>
    %cst_5 = arith.constant 0.000000e+00 : f32
    %6 = vector.broadcast %cst_5 : f32 to vector<16x128xf32>
    %7 = arith.maximumf %5, %6 : vector<16x128xf32>
    %c0_6 = arith.constant 0 : index
    %c0_7 = arith.constant 0 : index
    %8 = vector.load %arg4[%c0_6, %c0_7] : memref<16x16xf32, #tpu.memory_space<vmem>>, vector<16x16xf32>
    %cst_8 = arith.constant dense<0.000000e+00> : vector<16x128xf32>
    %9 = tpu.matmul %8, %7, %cst_8 {dimension_numbers = #tpu.dot_dimension_numbers<[1], [0], [0], [1], [0, 0, 1, 1], [], []>} : vector<16x16xf32>, vector<16x128xf32>, vector<16x128xf32> -> vector<16x128xf32>
    %c0_9 = arith.constant 0 : index
    %c0_10 = arith.constant 0 : index
    %10 = vector.load %arg5[%c0_9, %c0_10] : memref<16x1xf32, #tpu.memory_space<vmem>>, vector<16x1xf32>
    %11 = vector.broadcast %10 : vector<16x1xf32> to vector<16x128xf32>
    %12 = arith.addf %9, %11 : vector<16x128xf32>
    %cst_11 = arith.constant 0.000000e+00 : f32
    %13 = vector.broadcast %cst_11 : f32 to vector<16x128xf32>
    %14 = arith.maximumf %12, %13 : vector<16x128xf32>
    %c0_12 = arith.constant 0 : index
    %c0_13 = arith.constant 0 : index
    %15 = vector.load %arg6[%c0_12, %c0_13] : memref<4x16xf32, #tpu.memory_space<vmem>>, vector<4x16xf32>
    %cst_14 = arith.constant dense<0.000000e+00> : vector<4x128xf32>
    %16 = tpu.matmul %15, %14, %cst_14 {dimension_numbers = #tpu.dot_dimension_numbers<[1], [0], [0], [1], [0, 0, 1, 1], [], []>} : vector<4x16xf32>, vector<16x128xf32>, vector<4x128xf32> -> vector<4x128xf32>
    %c0_15 = arith.constant 0 : index
    %c0_16 = arith.constant 0 : index
    %17 = vector.load %arg7[%c0_15, %c0_16] : memref<4x1xf32, #tpu.memory_space<vmem>>, vector<4x1xf32>
    %18 = vector.broadcast %17 : vector<4x1xf32> to vector<4x128xf32>
    %19 = arith.addf %16, %18 : vector<4x128xf32>
    %cst_17 = arith.constant dense<0xFF800000> : vector<128xf32>
    %20 = vector.multi_reduction <maximumf>, %19, %cst_17 [0] : vector<4x128xf32> to vector<128xf32>
    %21 = vector.shape_cast %20 : vector<128xf32> to vector<1x128xf32>
    %22 = vector.broadcast %21 : vector<1x128xf32> to vector<4x128xf32>
    %23 = arith.subf %19, %22 : vector<4x128xf32>
    %24 = math.exp %23 : vector<4x128xf32>
    %cst_18 = arith.constant dense<0.000000e+00> : vector<128xf32>
    %25 = vector.multi_reduction <add>, %24, %cst_18 [0] : vector<4x128xf32> to vector<128xf32>
    %26 = vector.shape_cast %25 : vector<128xf32> to vector<1x128xf32>
    %27 = tpu.reciprocal %26 {approx = true} : vector<1x128xf32> -> vector<1x128xf32>
    %28 = arith.mulf %26, %27 : vector<1x128xf32>
    %cst_19 = arith.constant 2.000000e+00 : f32
    %29 = vector.broadcast %cst_19 : f32 to vector<1x128xf32>
    %30 = arith.subf %29, %28 : vector<1x128xf32>
    %31 = arith.mulf %27, %30 : vector<1x128xf32>
    %32 = vector.broadcast %31 : vector<1x128xf32> to vector<4x128xf32>
    %33 = arith.mulf %24, %32 : vector<4x128xf32>
    %c0_20 = arith.constant 0 : index
    %c0_21 = arith.constant 0 : index
    %34 = vector.load %arg8[%c0_20, %c0_21] : memref<4x128xf32, #tpu.memory_space<vmem>>, vector<4x128xf32>
    tpu.vector_store %arg8[%c0_20, %c0_21], %33 {strides = array<i32>} : memref<4x128xf32, #tpu.memory_space<vmem>>, vector<4x128xf32>,
    return
  }
  func.func @transform_0(%arg0: i32) -> (i32, i32) {
    %c0_i32 = arith.constant 0 : i32
    %c0_i32_0 = arith.constant 0 : i32
    return %c0_i32, %arg0 : i32, i32
  }
  func.func @transform_1(%arg0: i32) -> (i32, i32) {
    %c0_i32 = arith.constant 0 : i32
    %c0_i32_0 = arith.constant 0 : i32
    %c0_i32_1 = arith.constant 0 : i32
    return %c0_i32, %c0_i32_0 : i32, i32
  }
  func.func @transform_2(%arg0: i32) -> (i32, i32) {
    %c0_i32 = arith.constant 0 : i32
    %c0_i32_0 = arith.constant 0 : i32
    %c0_i32_1 = arith.constant 0 : i32
    return %c0_i32, %c0_i32_0 : i32, i32
  }
  func.func @transform_3(%arg0: i32) -> (i32, i32) {
    %c0_i32 = arith.constant 0 : i32
    %c0_i32_0 = arith.constant 0 : i32
    %c0_i32_1 = arith.constant 0 : i32
    return %c0_i32, %c0_i32_0 : i32, i32
  }
  func.func @transform_4(%arg0: i32) -> (i32, i32) {
    %c0_i32 = arith.constant 0 : i32
    %c0_i32_0 = arith.constant 0 : i32
    %c0_i32_1 = arith.constant 0 : i32
    return %c0_i32, %c0_i32_0 : i32, i32
  }
  func.func @transform_5(%arg0: i32) -> (i32, i32) {
    %c0_i32 = arith.constant 0 : i32
    %c0_i32_0 = arith.constant 0 : i32
    %c0_i32_1 = arith.constant 0 : i32
    return %c0_i32, %c0_i32_0 : i32, i32
  }
  func.func @transform_6(%arg0: i32) -> (i32, i32) {
    %c0_i32 = arith.constant 0 : i32
    %c0_i32_0 = arith.constant 0 : i32
    %c0_i32_1 = arith.constant 0 : i32
    return %c0_i32, %c0_i32_0 : i32, i32
  }
  func.func @transform_7(%arg0: i32) -> (i32, i32) {
    %c0_i32 = arith.constant 0 : i32
    %c0_i32_0 = arith.constant 0 : i32
    return %c0_i32, %arg0 : i32, i32
  }
}

</mosaic_0001>

<bundles_post_ra>
// kernel: vpg_forward.1
= control target key start
LH: loop header
LB: loop body
LE: loop exit
PB: predicated region body
PF: predicated region fallthrough
CT: control target
= control target key end

     0   :  { %vm41_vm0 = vcmask 64512   ;;  %v382_v3 = vmov 0   ;;  %vm139_vm1 = vcmask 130048   ;;  %v383_v20 = vmov 0.0|0.0   ;;  %s465_s0 = inlined_call_operand.vmem [shape: f32[8,128], index: 0, kind: input, shape index: {}]   ;;  %s466_s1 = inlined_call_operand.vmem [shape: f32[16,8], index: 1, kind: input, shape index: {}]   ;;  %s467_s2 = inlined_call_operand.vmem [shape: f32[16,1], index: 2, kind: input, shape index: {}]   ;;  %s468_s6 = inlined_call_operand.vmem [shape: f32[4,1], index: 6, kind: input, shape index: {}]   ;;  %s469_s3 = inlined_call_operand.vmem [shape: f32[16,16], index: 3, kind: input, shape index: {}]   ;;  %s470_s4 = inlined_call_operand.vmem [shape: f32[16,1], index: 4, kind: input, shape index: {}]   ;;  %s471_s5 = inlined_call_operand.vmem [shape: f32[4,16], index: 5, kind: input, shape index: {}]   ;;  %s472_s7 = inlined_call_operand.vmem [shape: f32[4,128], index: 7, kind: output, shape index: {}]  }
   0x1   :  { %v26_v0 = vld [vmem:[%s465_s0] sm:$0xff]  ;;  %v28_v2 = vld [vmem:[%s466_s1 + $0x8] sm:$0xff]  ;;  %376 = vset.pattern.permute.xlu0 %v382_v3  ;;  %377 = vset.pattern.permute.xlu1 %v382_v3  ;;  %vm384_vm2 = vmmov 0   ;;  %v385_v21 = vmov 0.0   ;;  %vm303_vm3 = vcmask 1043456  }
   0x2   :  { %v27_v1 = vld [vmem:[%s466_s1] sm:$0xff]  ;;  %346 = vmatprep.subr.mxu0 %v26_v0  ;;  %v30_v5 = vld [vmem:[%s467_s2 + $0x8] sm:$0xff] }
   0x3   :  { %348 = vmatprep.mubr.msk.f32.mxu0 %vm41_vm0, %v27_v1  ;;  %v29_v4 = vld [vmem:[%s467_s2] sm:$0xff]  ;;  %347 = vmatpush3.msra.mxu0 %v26_v0  ;;  %v128_v9 = vld [vmem:[%s470_s4 + $0x8] sm:$0xff] }
   0x4   :  { %33 = vperm.xlu0 %376, %v29_v4   ;;  %349 = vmatmul.mubr.msk.f32.vlgmr.msra.gmra.mrb[0].mxu0 %vm41_vm0, %v28_v2  ;;  %v224_v6 = vld [vmem:[%s468_s6] sm:$0xf]  ;;  %v126_v19 = vld [vmem:[%s469_s3 + $0x8] sm:$0xff] }
   0x5   :  { %v125_v7 = vld [vmem:[%s469_s3] sm:$0xff]  ;;  %369 = vmatprep.subr.bf16.mxu0 %v383_v20  ;;  %362 = vmatprep.mubr.msk.f32.mxu0 %vm384_vm2, %v385_v21 }
   0x6   :  { %355 = vmatprep.mubr.msk.f32.mxu1 %vm139_vm1, %v125_v7  ;;  %v127_v8 = vld [vmem:[%s470_s4] sm:$0xff] }
   0x7   :  { %131 = vperm.xlu1 %377, %v127_v8   ;;  %v223_v31 = vld [vmem:[%s471_s5] sm:$0xf] }
   0x8   :  { %38 = vperm.xlu0 %376, %v30_v5  }
   0xb   :  { %136 = vperm.xlu1 %377, %v128_v9  }
   0xc   :  { %227 = vperm.xlu0 %376, %v224_v6  }
  0x83   :  { %v34_v10 = vpop.permute.xlu0 %33 }
  0x86   :  { %v132_v22 = vpop.permute.xlu1 %131 }
  0x87   :  { %v39_v11 = vpop.permute.xlu0 %38 }
  0x8a   :  { %v137_v23 = vpop.permute.xlu1 %136 }
  0x8b   :  { %v228_v32 = vpop.permute.xlu0 %227 }
  0xd7   :  { %v350_v12 = vpop.f32.mrb[0].mxu0 }
  0xd8   :  { %v120_v13 = vadd.f32 %v350_v12, %v39_v11  ;;  %v114_v14 = vpop.f32.mrb[1].mxu0 }
  0xd9   :  { %v115_v15 = vadd.f32 %v114_v14, %v34_v10 }
  0xda   :  { %v124_v16 = vmax.f32 %v120_v13, 0.0 }
  0xdb   :  { %v123_v17 = vmax.f32 %v115_v15, 0.0 }
  0xdd   :  { %v365_v18 = vpack.c.bf16 %v124_v16, %v123_v17 }
  0xdf   :  { %366 = vmatprep.subr.bf16.mxu1 %v365_v18 }
  0xe0   :  { %368 = vmatpush3.bf16.msra.mxu1 %v365_v18 }
  0xe3   :  { %356 = vmatmul.mubr.msk.f32.vlgmr.msra.gmra.mrb[0].mxu1 %vm139_vm1, %v126_v19 }
 0x1b6   :  { %v357_v24 = vpop.f32.mrb[0].mxu1 }
 0x1b7   :  { %v218_v25 = vadd.f32 %v357_v24, %v137_v23  ;;  %v212_v26 = vpop.f32.mrb[1].mxu1 }
 0x1b8   :  { %v213_v27 = vadd.f32 %v212_v26, %v132_v22 }
 0x1b9   :  { %v222_v28 = vmax.f32 %v218_v25, 0.0 }
 0x1ba   :  { %v221_v29 = vmax.f32 %v213_v27, 0.0 }
 0x1bc   :  { %v370_v30 = vpack.c.bf16 %v222_v28, %v221_v29 }
 0x1be   :  { %371 = vmatpush3.bf16.msra.mxu0 %v370_v30 }
 0x1c1   :  { %363 = vmatmul.mubr.msk.f32.vlgmr.msra.gmra.mrb[2].mxu0 %vm139_vm1, %v223_v31 }
 0x294   :  { %v299_v33 = vpop.f32.mrb[2].mxu0 }
 0x295   :  { %v300_v34 = vadd.f32 %v299_v33, %v228_v32  ;;  %v364_v35 = vpop.f32.mrb[3].mxu0 }
 0x297   :  { %v304_v36 = vsel %vm303_vm3, %v300_v34, -inf }
 0x298   :  { %v305_v37 = vrot.slane %v304_v36, 4 }
 0x29a   :  { %v306_v38 = vmax.f32 %v304_v36, %v305_v37 }
 0x29c   :  { %v307_v39 = vrot.slane %v306_v38, 2 }
 0x29e   :  { %v308_v40 = vmax.f32 %v306_v38, %v307_v39 }
 0x2a0   :  { %v309_v41 = vrot.slane %v308_v40, 1 }
 0x2a2   :  { %v310_v42 = vmax.f32 %v308_v40, %v309_v41 }
 0x2a4   :  { %v311_v43 = vsub.f32 %v300_v34, %v310_v42 }
 0x2a6   :  { %v312_v44 = vmul.f32 1.442695, %v311_v43 }
 0x2a8   :  { %378 = vpow2.f32 %v312_v44 }
 0x2b2   :  { %v379_v45 = vpop.eup %378 }
 0x2b3   :  { %v314_v46 = vsel %vm303_vm3, %v379_v45, 0.0 }
 0x2b4   :  { %v315_v47 = vrot.slane %v314_v46, 4 }
 0x2b6   :  { %v316_v48 = vadd.f32 %v315_v47, %v314_v46 }
 0x2b8   :  { %v317_v49 = vrot.slane %v316_v48, 2 }
 0x2ba   :  { %v318_v50 = vadd.f32 %v317_v49, %v316_v48 }
 0x2bc   :  { %v319_v51 = vrot.slane %v318_v50, 1 }
 0x2be   :  { %v320_v52 = vadd.f32 %v319_v51, %v318_v50 }
 0x2c0   :  { %380 = vrcp.f32 %v320_v52 }
 0x2ca   :  { %v381_v53 = vpop.eup %380 }
 0x2cb   :  { %v322_v54 = vmul.f32 %v381_v53, %v320_v52 }
 0x2cd   :  { %v323_v55 = vsub.f32 2.0, %v322_v54 }
 0x2cf   :  { %v324_v56 = vmul.f32 %v381_v53, %v323_v55 }
 0x2d1   :  { %v325_v57 = vmul.f32 %v379_v45, %v324_v56 }
 0x2d3   :  { %326 = vst [vmem:[%s472_s7] sm:$0xf] %v325_v57 }

</bundles_post_ra>
